<compile_context>
chip_gen: v5e
topology: v5e:2x2
jax: 0.10.0
libtpu: 0.0.40
codegen_flags: <defaults>
</compile_context>

<pallas_src>
import functools

import jax
import jax.numpy as jnp
from jax.experimental import pallas as pl
from jax.experimental.pallas import tpu as pltpu


BN_EPS = 1e-5
LANE = 128
VMEM_LIMIT_BYTES = 32 * 1024 * 1024   # explicit; safe on v5e/v6e/v7x
DEFAULT_TILE_R = 512                  # rows (N*H*W) per tile
MAX_TILE_K = 2048                     # contraction tile (multiple of 128)
MAX_TILE_N = 512                      # output-channel tile (multiple of 128)


def _round_up(x, m):
    return ((x + m - 1) // m) * m


# ---------------------------------------------------------------------------
# Pass 1: tiled matmul (MXU, bf16 in / f32 acc) + per-tile partial BN stats.
# Grid = (row tiles, cout tiles, k tiles); k is a reduction axis.
# ---------------------------------------------------------------------------
def conv_matmul_stats_kernel(p_ref, w_ref, y_ref, stats_ref, acc_ref):
    k = pl.program_id(2)

    @pl.when(k == 0)
    def _():
        acc_ref[...] = jnp.zeros_like(acc_ref)

    acc_ref[...] += jnp.dot(p_ref[...], w_ref[...],
                            preferred_element_type=jnp.float32)

    @pl.when(k == pl.num_programs(2) - 1)
    def _():
        y = acc_ref[...]
        y_ref[...] = y.astype(y_ref.dtype)                 # bf16 intermediate
        s = jnp.sum(y, axis=0, keepdims=True)              # (1, tile_n)
        ss = jnp.sum(y * y, axis=0, keepdims=True)         # (1, tile_n)
        pad = jnp.zeros((6, s.shape[1]), jnp.float32)
        stats_ref[...] = jnp.concatenate([s, ss, pad], axis=0)


def _matmul_partial_stats(patches, w_mat, tile_r, tile_n, tile_k):
    Rp, Kp = patches.shape
    Cp = w_mat.shape[1]
    nr, nn, nk = Rp // tile_r, Cp // tile_n, Kp // tile_k
    grid_spec = pltpu.PrefetchScalarGridSpec(
        num_scalar_prefetch=0,
        grid=(nr, nn, nk),
        in_specs=[
            pl.BlockSpec((tile_r, tile_k), lambda i, j, k: (i, k)),
            pl.BlockSpec((tile_k, tile_n), lambda i, j, k: (k, j)),
        ],
        out_specs=[
            pl.BlockSpec((tile_r, tile_n), lambda i, j, k: (i, j)),
            pl.BlockSpec((None, 8, tile_n), lambda i, j, k: (i, 0, j)),
        ],
        scratch_shapes=[pltpu.VMEM((tile_r, tile_n), jnp.float32)],
    )
    y, stats = pl.pallas_call(
        conv_matmul_stats_kernel,
        out_shape=(jax.ShapeDtypeStruct((Rp, Cp), jnp.bfloat16),
                   jax.ShapeDtypeStruct((nr, 8, Cp), jnp.float32)),
        grid_spec=grid_spec,
        compiler_params=pltpu.CompilerParams(
            dimension_semantics=("parallel", "parallel", "arbitrary"),
            vmem_limit_bytes=VMEM_LIMIT_BYTES),
    )(patches, w_mat)
    return y, stats


# ---------------------------------------------------------------------------
# Pass 2: tiled fused normalize (y*scale + shift) + ReLU.
# ---------------------------------------------------------------------------
def norm_relu_kernel(y_ref, scale_ref, shift_ref, o_ref):
    z = y_ref[...].astype(jnp.float32) * scale_ref[...] + shift_ref[...]
    o_ref[...] = jnp.maximum(z, 0.0).astype(o_ref.dtype)


def _norm_relu(y, scale, shift, tile_r, tile_n, out_dtype):
    Rp, Cp = y.shape
    nr, nn = Rp // tile_r, Cp // tile_n
    grid_spec = pltpu.PrefetchScalarGridSpec(
        num_scalar_prefetch=0,
        grid=(nr, nn),
        in_specs=[
            pl.BlockSpec((tile_r, tile_n), lambda i, j: (i, j)),
            pl.BlockSpec((1, tile_n), lambda i, j: (0, j)),
            pl.BlockSpec((1, tile_n), lambda i, j: (0, j)),
        ],
        out_specs=pl.BlockSpec((tile_r, tile_n), lambda i, j: (i, j)),
    )
    return pl.pallas_call(
        norm_relu_kernel,
        out_shape=jax.ShapeDtypeStruct((Rp, Cp), out_dtype),
        grid_spec=grid_spec,
        compiler_params=pltpu.CompilerParams(
            dimension_semantics=("parallel", "parallel"),
            vmem_limit_bytes=VMEM_LIMIT_BYTES),
    )(y, scale, shift)


# ---------------------------------------------------------------------------
# JAX-side plumbing.
# ---------------------------------------------------------------------------
def _im2col_3x3_same(x_nhwc):
    """(N, H, W, C) -> (N*H*W, 9*C) rows, patch order (kh, kw, cin)."""
    N, H, W, C = x_nhwc.shape
    xp = jnp.pad(x_nhwc, ((0, 0), (1, 1), (1, 1), (0, 0)))
    cols = [xp[:, kh:kh + H, kw:kw + W, :] for kh in range(3) for kw in range(3)]
    patches = jnp.stack(cols, axis=3)                # (N, H, W, 9, C)
    return patches.reshape(N * H * W, 9 * C)


def _flatten_conv_weight(w_oihw):
    """(Cout, Cin, 3, 3) -> (9*Cin, Cout), matching (kh, kw, cin) patch order."""
    return jnp.transpose(w_oihw, (2, 3, 1, 0)).reshape(-1, w_oihw.shape[0])


def _bn_scale_shift(stats, gamma_p, beta_p, n_rows):
    """Combine per-tile partial sums into folded BN scale/shift (f32)."""
    sums = jnp.sum(stats[:, 0, :], axis=0)
    sqs = jnp.sum(stats[:, 1, :], axis=0)
    mean = sums / n_rows
    var = jnp.maximum(sqs / n_rows - mean * mean, 0.0)   # biased var, clamped
    scale = gamma_p * jax.lax.rsqrt(var + BN_EPS)
    shift = beta_p - mean * scale
    Cp = scale.shape[0]
    return (scale.reshape(1, Cp).astype(jnp.float32),
            shift.reshape(1, Cp).astype(jnp.float32))


def _conv_bn_relu_stage(x_nhwc, w_oihw, gamma, beta, *, tile_r, out_dtype):
    N, H, W, Cin = x_nhwc.shape
    Cout = w_oihw.shape[0]
    K = 9 * Cin
    R = N * H * W

    tile_k = min(_round_up(K, LANE), MAX_TILE_K)
    tile_n = min(_round_up(Cout, LANE), MAX_TILE_N)
    Kp = _round_up(_round_up(K, LANE), tile_k)
    Cp = _round_up(_round_up(Cout, LANE), tile_n)
    Rp = _round_up(R, tile_r)

    # im2col rows (bf16); zero-padded rows/cols contribute nothing to the
    # matmul or to the BN sums (y = 0 there), so stats stay exact when
    # divided by the true row count R.
    patches = _im2col_3x3_same(x_nhwc.astype(jnp.bfloat16))
    patches = jnp.pad(patches, ((0, Rp - R), (0, Kp - K)))

    w_mat = _flatten_conv_weight(w_oihw).astype(jnp.bfloat16)
    w_mat = jnp.pad(w_mat, ((0, Kp - K), (0, Cp - Cout)))

    y, stats = _matmul_partial_stats(patches, w_mat, tile_r, tile_n, tile_k)

    # Conv bias cancels exactly under training-mode BatchNorm (the batch mean
    # contains it), so it is folded away entirely.
    gamma_p = jnp.pad(gamma.astype(jnp.float32), (0, Cp - Cout))
    beta_p = jnp.pad(beta.astype(jnp.float32), (0, Cp - Cout))
    scale, shift = _bn_scale_shift(stats, gamma_p, beta_p, float(R))

    out = _norm_relu(y, scale, shift, tile_r, tile_n, out_dtype)
    return out[:R, :Cout].reshape(N, H, W, Cout)


def conv_block_forward(x_nchw, params, *, tile_r=DEFAULT_TILE_R):
    """ConvBlock forward. x_nchw: (N, Cin, H, W) f32 -> (N, Cout, H, W) f32."""
    assert tile_r % 8 == 0
    x = jnp.transpose(x_nchw, (0, 2, 3, 1))   # NHWC
    y1 = _conv_bn_relu_stage(x, params["w1"], params["g1"], params["be1"],
                             tile_r=tile_r, out_dtype=jnp.bfloat16)
    y2 = _conv_bn_relu_stage(y1, params["w2"], params["g2"], params["be2"],
                             tile_r=tile_r, out_dtype=jnp.float32)
    return jnp.transpose(y2, (0, 3, 1, 2))    # back to NCHW


def init_params(key, in_channels, out_channels):
    """Deterministic synthetic init (shapes match nn.Conv2d / nn.BatchNorm2d)."""
    k1, k2, k3, k4 = jax.random.split(key, 4)
    bound1 = 1.0 / jnp.sqrt(in_channels * 9)
    bound2 = 1.0 / jnp.sqrt(out_channels * 9)
    return {
        "w1": jax.random.uniform(k1, (out_channels, in_channels, 3, 3),
                                 jnp.float32, -bound1, bound1),
        "b1": jax.random.uniform(k2, (out_channels,), jnp.float32, -bound1, bound1),
        "g1": jnp.ones((out_channels,), jnp.float32),
        "be1": jnp.zeros((out_channels,), jnp.float32),
        "w2": jax.random.uniform(k3, (out_channels, out_channels, 3, 3),
                                 jnp.float32, -bound2, bound2),
        "b2": jax.random.uniform(k4, (out_channels,), jnp.float32, -bound2, bound2),
        "g2": jnp.ones((out_channels,), jnp.float32),
        "be2": jnp.zeros((out_channels,), jnp.float32),
    }


def _reference_forward(x_nchw, params):
    """Pure-JAX f32 reference (conv + training-mode BN + ReLU, bias cancels)."""
    def stage(x, w, g, b):
        y = jax.lax.conv_general_dilated(
            x, w, window_strides=(1, 1), padding="SAME",
            dimension_numbers=("NCHW", "OIHW", "NCHW"))
        mean = jnp.mean(y, axis=(0, 2, 3), keepdims=True)
        var = jnp.mean((y - mean) ** 2, axis=(0, 2, 3), keepdims=True)
        yh = (y - mean) * jax.lax.rsqrt(var + BN_EPS)
        return jnp.maximum(yh * g.reshape(1, -1, 1, 1) + b.reshape(1, -1, 1, 1), 0.0)
    y1 = stage(x_nchw, params["w1"], params["g1"], params["be1"])
    return stage(y1, params["w2"], params["g2"], params["be2"])


if __name__ == "__main__":
    key = jax.random.PRNGKey(0)
    kx, kp = jax.random.split(key)

    N, Cin, H, W = 2, 4, 16, 16
    Cout = 8
    x = jax.random.normal(kx, (N, Cin, H, W), jnp.float32)
    params = init_params(kp, Cin, Cout)

    # tile_r=128 at this small size exercises a 4-step row grid and the
    # cross-tile BN partial-sum combination.
    fwd = jax.jit(functools.partial(conv_block_forward, tile_r=128))
    out = jax.block_until_ready(fwd(x, params))

    assert out.shape == (N, Cout, H, W), out.shape
    assert out.dtype == jnp.float32
    assert bool(jnp.all(out >= 0.0))  # ReLU output

    ref = _reference_forward(x, params)
    max_err = float(jnp.max(jnp.abs(out - ref)))
    assert bool(jnp.allclose(out, ref, atol=1e-1, rtol=1e-1)), max_err

    print("KERNEL_OK")
</pallas_src>

<mosaic_0001>
module attributes {stable_mosaic.version = 11 : i64} {
  func.func @conv_matmul_stats_kernel(%arg0: i32, %arg1: i32, %arg2: i32, %arg3: memref<128x128xbf16, #tpu.memory_space<vmem>>, %arg4: memref<128x128xbf16, #tpu.memory_space<vmem>>, %arg5: memref<128x128xbf16, #tpu.memory_space<vmem>>, %arg6: memref<1x8x128xf32, #tpu.memory_space<vmem>>, %arg7: memref<128x128xf32, #tpu.memory_space<vmem>>) attributes {dimension_semantics = [#tpu.dimension_semantics<parallel>, #tpu.dimension_semantics<parallel>, #tpu.dimension_semantics<arbitrary>], iteration_bounds = array<i64: 4, 1, 1>, scalar_prefetch = 0 : i64, scratch_operands = 1 : i64, tpu.core_type = #tpu.core_type<tc>, window_params = [{transform_indices = @transform_0, window_bounds = array<i64: 128, 128>}, {transform_indices = @transform_1, window_bounds = array<i64: 128, 128>}, {transform_indices = @transform_2, window_bounds = array<i64: 128, 128>}, {transform_indices = @transform_3, window_bounds = array<i64: 1, 8, 128>}]} {
    %c0_i32 = arith.constant 0 : i32
    %0 = arith.cmpi eq, %arg2, %c0_i32 : i32
    %1 = arith.extui %0 : i1 to i32
    %c0_i32_0 = arith.constant 0 : i32
    %2 = arith.cmpi ne, %1, %c0_i32_0 : i32
    scf.if %2 {
      %cst_10 = arith.constant 0.000000e+00 : f32
      %12 = vector.broadcast %cst_10 : f32 to vector<128x128xf32>
      %c0_11 = arith.constant 0 : index
      %c0_12 = arith.constant 0 : index
      %13 = vector.load %arg7[%c0_11, %c0_12] : memref<128x128xf32, #tpu.memory_space<vmem>>, vector<128x128xf32>
      tpu.vector_store %arg7[%c0_11, %c0_12], %12 {strides = array<i32>} : memref<128x128xf32, #tpu.memory_space<vmem>>, vector<128x128xf32>,
    } else {
    }
    %c0 = arith.constant 0 : index
    %c0_1 = arith.constant 0 : index
    %3 = vector.load %arg7[%c0, %c0_1] : memref<128x128xf32, #tpu.memory_space<vmem>>, vector<128x128xf32>
    %c0_2 = arith.constant 0 : index
    %c0_3 = arith.constant 0 : index
    %4 = vector.load %arg3[%c0_2, %c0_3] : memref<128x128xbf16, #tpu.memory_space<vmem>>, vector<128x128xbf16>
    %c0_4 = arith.constant 0 : index
    %c0_5 = arith.constant 0 : index
    %5 = vector.load %arg4[%c0_4, %c0_5] : memref<128x128xbf16, #tpu.memory_space<vmem>>, vector<128x128xbf16>
    %cst = arith.constant dense<0.000000e+00> : vector<128x128xf32>
    %6 = tpu.matmul %4, %5, %cst {dimension_numbers = #tpu.dot_dimension_numbers<[1], [0], [0], [1], [0, 0, 1, 1], [], []>} : vector<128x128xbf16>, vector<128x128xbf16>, vector<128x128xf32> -> vector<128x128xf32>
    %7 = arith.addf %3, %6 : vector<128x128xf32>
    %c0_6 = arith.constant 0 : index
    %c0_7 = arith.constant 0 : index
    %8 = vector.load %arg7[%c0_6, %c0_7] : memref<128x128xf32, #tpu.memory_space<vmem>>, vector<128x128xf32>
    tpu.vector_store %arg7[%c0_6, %c0_7], %7 {strides = array<i32>} : memref<128x128xf32, #tpu.memory_space<vmem>>, vector<128x128xf32>,
    %c0_i32_8 = arith.constant 0 : i32
    %9 = arith.cmpi eq, %arg2, %c0_i32_8 : i32
    %10 = arith.extui %9 : i1 to i32
    %c0_i32_9 = arith.constant 0 : i32
    %11 = arith.cmpi ne, %10, %c0_i32_9 : i32
    scf.if %11 {
      %c0_10 = arith.constant 0 : index
      %c0_11 = arith.constant 0 : index
      %12 = vector.load %arg7[%c0_10, %c0_11] : memref<128x128xf32, #tpu.memory_space<vmem>>, vector<128x128xf32>
      %13 = arith.truncf %12 : vector<128x128xf32> to vector<128x128xbf16>
      %c0_12 = arith.constant 0 : index
      %c0_13 = arith.constant 0 : index
      %14 = vector.load %arg5[%c0_12, %c0_13] : memref<128x128xbf16, #tpu.memory_space<vmem>>, vector<128x128xbf16>
      tpu.vector_store %arg5[%c0_12, %c0_13], %13 {strides = array<i32>} : memref<128x128xbf16, #tpu.memory_space<vmem>>, vector<128x128xbf16>,
      %cst_14 = arith.constant dense<0.000000e+00> : vector<128xf32>
      %15 = vector.multi_reduction <add>, %12, %cst_14 [0] : vector<128x128xf32> to vector<128xf32>
      %16 = vector.shape_cast %15 : vector<128xf32> to vector<1x128xf32>
      %17 = arith.mulf %12, %12 : vector<128x128xf32>
      %cst_15 = arith.constant dense<0.000000e+00> : vector<128xf32>
      %18 = vector.multi_reduction <add>, %17, %cst_15 [0] : vector<128x128xf32> to vector<128xf32>
      %19 = vector.shape_cast %18 : vector<128xf32> to vector<1x128xf32>
      %cst_16 = arith.constant 0.000000e+00 : f32
      %20 = vector.broadcast %cst_16 : f32 to vector<6x128xf32>
      %21 = tpu.concatenate %16, %19, %20 in 0 : vector<1x128xf32>, vector<1x128xf32>, vector<6x128xf32> -> vector<8x128xf32>
      %c0_17 = arith.constant 0 : index
      %c0_18 = arith.constant 0 : index
      %c0_19 = arith.constant 0 : index
      %22 = vector.load %arg6[%c0_17, %c0_18, %c0_19] : memref<1x8x128xf32, #tpu.memory_space<vmem>>, vector<1x8x128xf32>
      %23 = vector.shape_cast %22 : vector<1x8x128xf32> to vector<8x128xf32>
      %24 = vector.shape_cast %21 : vector<8x128xf32> to vector<1x8x128xf32>
      tpu.vector_store %arg6[%c0_17, %c0_18, %c0_19], %24 {strides = array<i32>} : memref<1x8x128xf32, #tpu.memory_space<vmem>>, vector<1x8x128xf32>,
    } else {
    }
    return
  }
  func.func @transform_0(%arg0: i32, %arg1: i32, %arg2: i32) -> (i32, i32) {
    %c0_i32 = arith.constant 0 : i32
    return %arg0, %arg2 : i32, i32
  }
  func.func @transform_1(%arg0: i32, %arg1: i32, %arg2: i32) -> (i32, i32) {
    %c0_i32 = arith.constant 0 : i32
    return %arg2, %arg1 : i32, i32
  }
  func.func @transform_2(%arg0: i32, %arg1: i32, %arg2: i32) -> (i32, i32) {
    %c0_i32 = arith.constant 0 : i32
    return %arg0, %arg1 : i32, i32
  }
  func.func @transform_3(%arg0: i32, %arg1: i32, %arg2: i32) -> (i32, i32, i32) {
    %c0_i32 = arith.constant 0 : i32
    %c0_i32_0 = arith.constant 0 : i32
    return %arg0, %c0_i32, %arg1 : i32, i32, i32
  }
}

module attributes {stable_mosaic.version = 11 : i64} {
  func.func @norm_relu_kernel(%arg0: i32, %arg1: i32, %arg2: memref<128x128xbf16, #tpu.memory_space<vmem>>, %arg3: memref<1x128xf32, #tpu.memory_space<vmem>>, %arg4: memref<1x128xf32, #tpu.memory_space<vmem>>, %arg5: memref<128x128xbf16, #tpu.memory_space<vmem>>) attributes {dimension_semantics = [#tpu.dimension_semantics<parallel>, #tpu.dimension_semantics<parallel>], iteration_bounds = array<i64: 4, 1>, scalar_prefetch = 0 : i64, scratch_operands = 0 : i64, tpu.core_type = #tpu.core_type<tc>, window_params = [{transform_indices = @transform_0, window_bounds = array<i64: 128, 128>}, {transform_indices = @transform_1, window_bounds = array<i64: 1, 128>}, {transform_indices = @transform_2, window_bounds = array<i64: 1, 128>}, {transform_indices = @transform_3, window_bounds = array<i64: 128, 128>}]} {
    %c0 = arith.constant 0 : index
    %c0_0 = arith.constant 0 : index
    %0 = vector.load %arg2[%c0, %c0_0] : memref<128x128xbf16, #tpu.memory_space<vmem>>, vector<128x128xbf16>
    %1 = arith.extf %0 : vector<128x128xbf16> to vector<128x128xf32>
    %c0_1 = arith.constant 0 : index
    %c0_2 = arith.constant 0 : index
    %2 = vector.load %arg3[%c0_1, %c0_2] : memref<1x128xf32, #tpu.memory_space<vmem>>, vector<1x128xf32>
    %3 = vector.broadcast %2 : vector<1x128xf32> to vector<128x128xf32>
    %4 = arith.mulf %1, %3 : vector<128x128xf32>
    %c0_3 = arith.constant 0 : index
    %c0_4 = arith.constant 0 : index
    %5 = vector.load %arg4[%c0_3, %c0_4] : memref<1x128xf32, #tpu.memory_space<vmem>>, vector<1x128xf32>
    %6 = vector.broadcast %5 : vector<1x128xf32> to vector<128x128xf32>
    %7 = arith.addf %4, %6 : vector<128x128xf32>
    %cst = arith.constant 0.000000e+00 : f32
    %8 = vector.broadcast %cst : f32 to vector<128x128xf32>
    %9 = arith.maximumf %7, %8 : vector<128x128xf32>
    %10 = arith.truncf %9 : vector<128x128xf32> to vector<128x128xbf16>
    %c0_5 = arith.constant 0 : index
    %c0_6 = arith.constant 0 : index
    %11 = vector.load %arg5[%c0_5, %c0_6] : memref<128x128xbf16, #tpu.memory_space<vmem>>, vector<128x128xbf16>
    tpu.vector_store %arg5[%c0_5, %c0_6], %10 {strides = array<i32>} : memref<128x128xbf16, #tpu.memory_space<vmem>>, vector<128x128xbf16>,
    return
  }
  func.func @transform_0(%arg0: i32, %arg1: i32) -> (i32, i32) {
    %c0_i32 = arith.constant 0 : i32
    return %arg0, %arg1 : i32, i32
  }
  func.func @transform_1(%arg0: i32, %arg1: i32) -> (i32, i32) {
    %c0_i32 = arith.constant 0 : i32
    %c0_i32_0 = arith.constant 0 : i32
    return %c0_i32, %arg1 : i32, i32
  }
  func.func @transform_2(%arg0: i32, %arg1: i32) -> (i32, i32) {
    %c0_i32 = arith.constant 0 : i32
    %c0_i32_0 = arith.constant 0 : i32
    return %c0_i32, %arg1 : i32, i32
  }
  func.func @transform_3(%arg0: i32, %arg1: i32) -> (i32, i32) {
    %c0_i32 = arith.constant 0 : i32
    return %arg0, %arg1 : i32, i32
  }
}

module attributes {stable_mosaic.version = 11 : i64} {
  func.func @norm_relu_kernel(%arg0: i32, %arg1: i32, %arg2: memref<128x128xbf16, #tpu.memory_space<vmem>>, %arg3: memref<1x128xf32, #tpu.memory_space<vmem>>, %arg4: memref<1x128xf32, #tpu.memory_space<vmem>>, %arg5: memref<128x128xf32, #tpu.memory_space<vmem>>) attributes {dimension_semantics = [#tpu.dimension_semantics<parallel>, #tpu.dimension_semantics<parallel>], iteration_bounds = array<i64: 4, 1>, scalar_prefetch = 0 : i64, scratch_operands = 0 : i64, tpu.core_type = #tpu.core_type<tc>, window_params = [{transform_indices = @transform_0, window_bounds = array<i64: 128, 128>}, {transform_indices = @transform_1, window_bounds = array<i64: 1, 128>}, {transform_indices = @transform_2, window_bounds = array<i64: 1, 128>}, {transform_indices = @transform_3, window_bounds = array<i64: 128, 128>}]} {
    %c0 = arith.constant 0 : index
    %c0_0 = arith.constant 0 : index
    %0 = vector.load %arg2[%c0, %c0_0] : memref<128x128xbf16, #tpu.memory_space<vmem>>, vector<128x128xbf16>
    %1 = arith.extf %0 : vector<128x128xbf16> to vector<128x128xf32>
    %c0_1 = arith.constant 0 : index
    %c0_2 = arith.constant 0 : index
    %2 = vector.load %arg3[%c0_1, %c0_2] : memref<1x128xf32, #tpu.memory_space<vmem>>, vector<1x128xf32>
    %3 = vector.broadcast %2 : vector<1x128xf32> to vector<128x128xf32>
    %4 = arith.mulf %1, %3 : vector<128x128xf32>
    %c0_3 = arith.constant 0 : index
    %c0_4 = arith.constant 0 : index
    %5 = vector.load %arg4[%c0_3, %c0_4] : memref<1x128xf32, #tpu.memory_space<vmem>>, vector<1x128xf32>
    %6 = vector.broadcast %5 : vector<1x128xf32> to vector<128x128xf32>
    %7 = arith.addf %4, %6 : vector<128x128xf32>
    %cst = arith.constant 0.000000e+00 : f32
    %8 = vector.broadcast %cst : f32 to vector<128x128xf32>
    %9 = arith.maximumf %7, %8 : vector<128x128xf32>
    %c0_5 = arith.constant 0 : index
    %c0_6 = arith.constant 0 : index
    %10 = vector.load %arg5[%c0_5, %c0_6] : memref<128x128xf32, #tpu.memory_space<vmem>>, vector<128x128xf32>
    tpu.vector_store %arg5[%c0_5, %c0_6], %9 {strides = array<i32>} : memref<128x128xf32, #tpu.memory_space<vmem>>, vector<128x128xf32>,
    return
  }
  func.func @transform_0(%arg0: i32, %arg1: i32) -> (i32, i32) {
    %c0_i32 = arith.constant 0 : i32
    return %arg0, %arg1 : i32, i32
  }
  func.func @transform_1(%arg0: i32, %arg1: i32) -> (i32, i32) {
    %c0_i32 = arith.constant 0 : i32
    %c0_i32_0 = arith.constant 0 : i32
    return %c0_i32, %arg1 : i32, i32
  }
  func.func @transform_2(%arg0: i32, %arg1: i32) -> (i32, i32) {
    %c0_i32 = arith.constant 0 : i32
    %c0_i32_0 = arith.constant 0 : i32
    return %c0_i32, %arg1 : i32, i32
  }
  func.func @transform_3(%arg0: i32, %arg1: i32) -> (i32, i32) {
    %c0_i32 = arith.constant 0 : i32
    return %arg0, %arg1 : i32, i32
  }
}

</mosaic_0001>

<bundles_post_ra>
// kernel: conv_block_forward.5
= control target key start
LH: loop header
LB: loop body
LE: loop exit
PB: predicated region body
PF: predicated region fallthrough
CT: control target
= control target key end

     0   :  { %s624_s12 = smov 0   ;;  %s626_s13 = smov 0   ;;  %s726_s0 = inlined_call_operand.vmem [shape: bf16[512,128], index: 0, kind: input, shape index: {}]   ;;  %s727_s1 = inlined_call_operand.vmem [shape: f32[1,128], index: 1, kind: input, shape index: {}]   ;;  %s728_s2 = inlined_call_operand.vmem [shape: f32[1,128], index: 2, kind: input, shape index: {}]   ;;  %s729_s3 = inlined_call_operand.vmem [shape: bf16[512,128], index: 3, kind: output, shape index: {}]  }
   0x1   :  { %s628_s14 = smov 0  }
   0x2 LB: > { %s25_s15 = sadd.s32 1, %s598_s13  ;;  %p461_p0 = scmp.ge.s32.totalorder %s602_s14, 1  ;;  %s602_s14 = sphi %s628_s14, %s13_s14   ;;  %s598_s13 = sphi %s626_s13, %s731_s13   ;;  %s594_s12 = sphi %s624_s12, %s730_s12  }
   0x3   : > { %p27_p1 = scmp.ge.s32.totalorder %s25_s15, 4  ;;  %p173_p2 = scmp.lt.s32.totalorder %s602_s14, 5 }
   0x5   : > { %s733_s15 = smov (%p27_p1, %s25_s15), 0  ;;  %p174_p3 = pnand %p461_p0, %p173_p2 }
   0x6   : > { %s462_s16 = sshll.u32 (!%p174_p3), %s594_s12, 4 }
   0x7   : > { %177 = sbr.rel (%p174_p3) target bundleno = 38 (0x26), region = 32  ;;  %p210_p4 = scmp.lt.s32.totalorder (!%p174_p3), %s462_s16, 63 }
   0xc   : > { %s735_s16 = smov (!%p210_p4, %s462_s16), 63  ;;  %v655_v0 = vld [vmem:[%s727_s1] ss:$0 sm:$0xff] }
   0xd   : > { %s463_s17 = sshll.u32 %s735_s16, 2  ;;  %v663_v6 = vld [vmem:[%s728_s2] ss:$0 sm:$0xff] }
   0xe   : > { %s650_s20 = scalar_lea.vmem %s726_s0, %s463_s17  ;;  %s689_s27 = scalar_lea.vmem %s729_s3, %s463_s17 }
   0xf   : > { %v469_v1 = vld [vmem:[%s650_s20] sm:$0xff]   ;;  %v540_v2 = vld [vmem:[%s650_s20 + $0x8] sm:$0xff]   ;;  %v541_v3 = vld [vmem:[%s650_s20 + $0x10] sm:$0xff]  }
  0x10   : > { %v470_v4 = vunpack.c.l.bf16 %v469_v1  ;;  %v471_v5 = vunpack.c.h.bf16 %v469_v1  ;;  %v474_v7 = vunpack.c.l.bf16 %v540_v2  ;;  %v475_v8 = vunpack.c.h.bf16 %v540_v2  ;;  %v542_v9 = vld [vmem:[%s650_s20 + $0x18] sm:$0xff]   ;;  %v543_v30 = vld [vmem:[%s650_s20 + $0x20] sm:$0xff]   ;;  %v544_v35 = vld [vmem:[%s650_s20 + $0x28] sm:$0xff]  }
  0x11   : > { %v478_v10 = vunpack.c.l.bf16 %v541_v3  ;;  %v479_v11 = vunpack.c.h.bf16 %v541_v3  ;;  %v482_v12 = vunpack.c.l.bf16 %v542_v9  ;;  %v483_v13 = vunpack.c.h.bf16 %v542_v9  ;;  %v545_v40 = vld [vmem:[%s650_s20 + $0x30] sm:$0xff]   ;;  %v546_v45 = vld [vmem:[%s650_s20 + $0x38] sm:$0xff]  }
  0x12   : > { %v269_v14 = vmul.f32 %v655_v0, %v470_v4  ;;  %v270_v15 = vmul.f32 %v655_v0, %v471_v5  ;;  %v271_v16 = vmul.f32 %v655_v0, %v474_v7  ;;  %v272_v17 = vmul.f32 %v655_v0, %v475_v8 }
  0x13   : > { %v273_v18 = vmul.f32 %v655_v0, %v478_v10  ;;  %v274_v19 = vmul.f32 %v655_v0, %v479_v11  ;;  %v275_v20 = vmul.f32 %v655_v0, %v482_v12  ;;  %v276_v21 = vmul.f32 %v655_v0, %v483_v13 }
  0x14   : > { %v289_v22 = vadd.f32 %v663_v6, %v269_v14  ;;  %v290_v23 = vadd.f32 %v663_v6, %v270_v15  ;;  %v291_v24 = vadd.f32 %v663_v6, %v271_v16  ;;  %v292_v25 = vadd.f32 %v663_v6, %v272_v17 }
  0x15   : > { %v293_v26 = vadd.f32 %v663_v6, %v273_v18  ;;  %v294_v27 = vadd.f32 %v663_v6, %v274_v19  ;;  %v295_v28 = vadd.f32 %v663_v6, %v275_v20  ;;  %v296_v29 = vadd.f32 %v663_v6, %v276_v21 }
  0x16   : > { %v305_v31 = vmax.f32 %v289_v22, 0.0  ;;  %v306_v32 = vmax.f32 %v290_v23, 0.0  ;;  %v307_v33 = vmax.f32 %v291_v24, 0.0  ;;  %v308_v34 = vmax.f32 %v292_v25, 0.0 }
  0x17   : > { %v309_v36 = vmax.f32 %v293_v26, 0.0  ;;  %v310_v37 = vmax.f32 %v294_v27, 0.0  ;;  %v311_v38 = vmax.f32 %v295_v28, 0.0  ;;  %v312_v39 = vmax.f32 %v296_v29, 0.0 }
  0x18   : > { %v503_v41 = vpack.c.bf16 %v306_v32, %v305_v31  ;;  %v508_v42 = vpack.c.bf16 %v308_v34, %v307_v33  ;;  %v486_v43 = vunpack.c.l.bf16 %v543_v30  ;;  %v487_v44 = vunpack.c.h.bf16 %v543_v30 }
  0x19   : > { %v513_v46 = vpack.c.bf16 %v310_v37, %v309_v36  ;;  %v518_v47 = vpack.c.bf16 %v312_v39, %v311_v38  ;;  %v490_v48 = vunpack.c.l.bf16 %v544_v35  ;;  %v491_v49 = vunpack.c.h.bf16 %v544_v35 }
  0x1a   : > { %504 = vst [vmem:[%s689_s27] sm:$0xff] %v503_v41   ;;  %v277_v50 = vmul.f32 %v655_v0, %v486_v43  ;;  %v278_v51 = vmul.f32 %v655_v0, %v487_v44  ;;  %v494_v52 = vunpack.c.l.bf16 %v545_v40  ;;  %v495_v53 = vunpack.c.h.bf16 %v545_v40 }
  0x1b   : > { %547 = vst [vmem:[%s689_s27 + $0x8] sm:$0xff] %v508_v42   ;;  %v279_v54 = vmul.f32 %v655_v0, %v490_v48  ;;  %v280_v55 = vmul.f32 %v655_v0, %v491_v49  ;;  %v498_v56 = vunpack.c.l.bf16 %v546_v45  ;;  %v499_v57 = vunpack.c.h.bf16 %v546_v45 }
  0x1c   : > { %548 = vst [vmem:[%s689_s27 + $0x10] sm:$0xff] %v513_v46   ;;  %v297_v58 = vadd.f32 %v663_v6, %v277_v50  ;;  %v298_v59 = vadd.f32 %v663_v6, %v278_v51  ;;  %v281_v60 = vmul.f32 %v655_v0, %v494_v52  ;;  %v282_v61 = vmul.f32 %v655_v0, %v495_v53 }
  0x1d   : > { %549 = vst [vmem:[%s689_s27 + $0x18] sm:$0xff] %v518_v47   ;;  %v299_v62 = vadd.f32 %v663_v6, %v279_v54  ;;  %v300_v63 = vadd.f32 %v663_v6, %v280_v55  ;;  %v283_v1 = vmul.f32 %v655_v0, %v498_v56  ;;  %v284_v2 = vmul.f32 %v655_v0, %v499_v57 }
  0x1e   : > { %v313_v3 = vmax.f32 %v297_v58, 0.0  ;;  %v314_v4 = vmax.f32 %v298_v59, 0.0  ;;  %v301_v5 = vadd.f32 %v663_v6, %v281_v60  ;;  %v302_v7 = vadd.f32 %v663_v6, %v282_v61 }
  0x1f   : > { %v315_v8 = vmax.f32 %v299_v62, 0.0  ;;  %v316_v9 = vmax.f32 %v300_v63, 0.0  ;;  %v303_v10 = vadd.f32 %v663_v6, %v283_v1  ;;  %v304_v11 = vadd.f32 %v663_v6, %v284_v2 }
  0x20   : > { %v523_v12 = vpack.c.bf16 %v314_v4, %v313_v3  ;;  %v317_v13 = vmax.f32 %v301_v5, 0.0  ;;  %v318_v14 = vmax.f32 %v302_v7, 0.0 }
  0x21   : > { %v528_v15 = vpack.c.bf16 %v316_v9, %v315_v8  ;;  %v319_v0 = vmax.f32 %v303_v10, 0.0  ;;  %v320_v16 = vmax.f32 %v304_v11, 0.0 }
  0x22   : > { %550 = vst [vmem:[%s689_s27 + $0x20] sm:$0xff] %v523_v12   ;;  %v533_v17 = vpack.c.bf16 %v318_v14, %v317_v13 }
  0x23   : > { %551 = vst [vmem:[%s689_s27 + $0x28] sm:$0xff] %v528_v15   ;;  %v538_v18 = vpack.c.bf16 %v320_v16, %v319_v0 }
  0x24   : > { %552 = vst [vmem:[%s689_s27 + $0x30] sm:$0xff] %v533_v17  }
  0x25   : > { %553 = vst [vmem:[%s689_s27 + $0x38] sm:$0xff] %v538_v18  }
  0x26 PF: > { %s13_s14 = sadd.s32 1, %s602_s14   ;;  %s730_s12 = smov %s598_s13 }
  0x27   : > { %p10_p5 = scmp.ge.s32.totalorder %s13_s14, 6   ;;  %s731_s13 = smov %s733_s15 }
  0x29   :  { %12 = sbr.rel (!%p10_p5) target bundleno = 2 (0x2), region = 68 }

// kernel: conv_block_forward.4
= control target key start
LH: loop header
LB: loop body
LE: loop exit
PB: predicated region body
PF: predicated region fallthrough
CT: control target
= control target key end

     0   :  { %s995_s12 = smov 0   ;;  %s997_s13 = smov 0   ;;  %s1083_s0 = inlined_call_operand.vmem [shape: bf16[512,128], index: 0, kind: input, shape index: {}]   ;;  %s1084_s1 = inlined_call_operand.vmem [shape: bf16[128,128], index: 1, kind: input, shape index: {}]   ;;  %s1085_s2 = inlined_call_operand.vmem [shape: bf16[512,128], index: 2, kind: output, shape index: {0}]   ;;  %s1086_s3 = inlined_call_operand.vmem [shape: f32[4,8,128], index: 3, kind: output, shape index: {1}]  }
   0x1   :  { %s999_s14 = smov 0  }
   0x2 LB: > { %s33_s15 = sadd.s32 1, %s969_s13  ;;  %p768_p0 = scmp.ge.s32.totalorder %s973_s14, 1  ;;  %s973_s14 = sphi %s999_s14, %s14_s14   ;;  %s969_s13 = sphi %s997_s13, %s1088_s13   ;;  %s965_s12 = sphi %s995_s12, %s1087_s12  }
   0x3   : > { %p35_p1 = scmp.ge.s32.totalorder %s33_s15, 4  ;;  %p185_p2 = scmp.lt.s32.totalorder %s973_s14, 5 }
   0x5   : > { %s1090_s15 = smov (%p35_p1, %s33_s15), 0  ;;  %p186_p3 = pnand %p768_p0, %p185_p2 }
   0x6   : > { %s769_s24 = sshll.u32 (!%p186_p3), %s965_s12, 4  ;;  %p257_p5 = scmp.lt.s32.totalorder (!%p186_p3), %s965_s12, 3 }
   0x7   : > { %189 = sbr.rel (%p186_p3) target bundleno = 237 (0xed), region = 28  ;;  %p231_p4 = scmp.lt.s32.totalorder (!%p186_p3), %s769_s24, 63 }
   0xc   : > { %v855_v0 = vld [vmem:[%s1084_s1 + $0x38] sm:$0xff]  ;;  %v854_v1 = vld [vmem:[%s1084_s1 + $0x30] sm:$0xff]  ;;  %v853_v2 = vld [vmem:[%s1084_s1 + $0x28] sm:$0xff]  ;;  %s1092_s24 = smov (!%p231_p4, %s769_s24), 63  ;;  %s1094_s12 = smov (!%p257_p5, %s965_s12), 3  ;;  %vm618_vm0 = vcmask 1040384  }
   0xd   : > { %428 = vmatpush.bf16.msra.mxu0 %v855_v0  ;;  %903 = vmatpush.bf16.msra.mxu1 %v855_v0  ;;  %v852_v3 = vld [vmem:[%s1084_s1 + $0x20] sm:$0xff]  ;;  %v851_v4 = vld [vmem:[%s1084_s1 + $0x18] sm:$0xff]  ;;  %v850_v5 = vld [vmem:[%s1084_s1 + $0x10] sm:$0xff]  ;;  %s770_s4 = sshll.u32 %s1092_s24, 2  ;;  %s773_s17 = sshll.u32 %s1094_s12, 3  ;;  %vm620_vm1 = vcmask 1041408  }
   0xe   : > { %904 = vmatpush.bf16.msra.mxu2 %v855_v0  ;;  %905 = vmatpush.bf16.msra.mxu3 %v855_v0  ;;  %v849_v6 = vld [vmem:[%s1084_s1 + $0x8] sm:$0xff]  ;;  %v848_v7 = vld [vmem:[%s1084_s1] sm:$0xff]  ;;  %s237_s9 = scalar_lea.vmem %s1083_s0, %s770_s4  ;;  %s1055_s16 = scalar_lea.vmem %s1085_s2, %s770_s4 }
   0xf   : > { %v840_v8 = vld [vmem:[%s237_s9] sm:$0xff]  ;;  %v842_v9 = vld [vmem:[%s237_s9 + $0x10] sm:$0xff]  ;;  %v841_v12 = vld [vmem:[%s237_s9 + $0x8] sm:$0xff]  ;;  %s263_s20 = scalar_lea.vmem %s1086_s3, %s773_s17 }
  0x10   : > { %v844_v10 = vld [vmem:[%s237_s9 + $0x20] sm:$0xff]  ;;  %v846_v11 = vld [vmem:[%s237_s9 + $0x30] sm:$0xff]  ;;  %v843_v13 = vld [vmem:[%s237_s9 + $0x18] sm:$0xff] }
  0x11   : > { %429 = vmatpush.bf16.msra.mxu0 %v854_v1  ;;  %906 = vmatpush.bf16.msra.mxu1 %v854_v1  ;;  %v845_v14 = vld [vmem:[%s237_s9 + $0x28] sm:$0xff]  ;;  %v847_v15 = vld [vmem:[%s237_s9 + $0x38] sm:$0xff] }
  0x12   : > { %907 = vmatpush.bf16.msra.mxu2 %v854_v1  ;;  %908 = vmatpush.bf16.msra.mxu3 %v854_v1 }
  0x15   : > { %430 = vmatpush.bf16.msra.mxu0 %v853_v2  ;;  %909 = vmatpush.bf16.msra.mxu1 %v853_v2 }
  0x16   : > { %910 = vmatpush.bf16.msra.mxu2 %v853_v2  ;;  %911 = vmatpush.bf16.msra.mxu3 %v853_v2 }
  0x19   : > { %431 = vmatpush.bf16.msra.mxu0 %v852_v3  ;;  %912 = vmatpush.bf16.msra.mxu1 %v852_v3 }
  0x1a   : > { %913 = vmatpush.bf16.msra.mxu2 %v852_v3  ;;  %914 = vmatpush.bf16.msra.mxu3 %v852_v3 }
  0x1d   : > { %432 = vmatpush.bf16.msra.mxu0 %v851_v4  ;;  %915 = vmatpush.bf16.msra.mxu1 %v851_v4 }
  0x1e   : > { %916 = vmatpush.bf16.msra.mxu2 %v851_v4  ;;  %917 = vmatpush.bf16.msra.mxu3 %v851_v4 }
  0x21   : > { %433 = vmatpush.bf16.msra.mxu0 %v850_v5  ;;  %918 = vmatpush.bf16.msra.mxu1 %v850_v5 }
  0x22   : > { %919 = vmatpush.bf16.msra.mxu2 %v850_v5  ;;  %920 = vmatpush.bf16.msra.mxu3 %v850_v5 }
  0x25   : > { %434 = vmatpush.bf16.msra.mxu0 %v849_v6  ;;  %921 = vmatpush.bf16.msra.mxu1 %v849_v6 }
  0x26   : > { %922 = vmatpush.bf16.msra.mxu2 %v849_v6  ;;  %923 = vmatpush.bf16.msra.mxu3 %v849_v6 }
  0x29   : > { %435 = vmatpush.bf16.msra.mxu0 %v848_v7  ;;  %924 = vmatpush.bf16.msra.mxu1 %v848_v7 }
  0x2a   : > { %925 = vmatpush.bf16.msra.mxu2 %v848_v7  ;;  %926 = vmatpush.bf16.msra.mxu3 %v848_v7 }
  0x2c   : > { %436 = vmatmul.bf16.vlgmr.msra.gmra.mxu0 %v840_v8  ;;  %446 = vmatmul.bf16.vlgmr.msra.gmra.mxu1 %v842_v9 }
  0x2d   : > { %456 = vmatmul.bf16.vlgmr.msra.gmra.mxu2 %v844_v10  ;;  %466 = vmatmul.bf16.vlgmr.msra.gmra.mxu3 %v846_v11 }
  0x3c   : > { %441 = vmatmul.bf16.gmra.mxu0 %v841_v12  ;;  %451 = vmatmul.bf16.gmra.mxu1 %v843_v13 }
  0x3d   : > { %461 = vmatmul.bf16.gmra.mxu2 %v845_v14  ;;  %471 = vmatmul.bf16.gmra.mxu3 %v847_v15 }
  0xa9   : > { %v437_v16 = vpop.f32.mrf.mxu0  ;;  %v447_v17 = vpop.f32.mrf.mxu1 }
  0xaa   : > { %v581_v31 = vmul.f32 %v437_v16, %v437_v16  ;;  %v585_v45 = vmul.f32 %v447_v17, %v447_v17 }
  0xb0   : > { %v457_v18 = vpop.f32.mrf.mxu2  ;;  %v1048_v19 = vpop.f32.mrf.mxu3 }
  0xb1   : > { %v439_v20 = vpop.f32.mrf.mxu0  ;;  %v449_v21 = vpop.f32.mrf.mxu1  ;;  %v589_v61 = vmul.f32 %v457_v18, %v457_v18  ;;  %v593_v9 = vmul.f32 %v1048_v19, %v1048_v19 }
  0xb2   : > { %v859_v22 = vpack.c.bf16 %v439_v20, %v437_v16  ;;  %v869_v23 = vpack.c.bf16 %v449_v21, %v447_v17  ;;  %v582_v30 = vmul.f32 %v439_v20, %v439_v20  ;;  %v560_v33 = vadd.f32 %v439_v20, %v437_v16 }
  0xb3   : > { %v586_v48 = vmul.f32 %v449_v21, %v449_v21 }
  0xb4   : > { %860 = vst [vmem:[%s1055_s16] sm:$0xff] %v859_v22   ;;  %v597_v34 = vadd.f32 %v582_v30, %v581_v31 }
  0xb5   : > { %897 = vst [vmem:[%s1055_s16 + $0x10] sm:$0xff] %v869_v23  }
  0xb8   : > { %v459_v24 = vpop.f32.mrf.mxu2  ;;  %v469_v25 = vpop.f32.mrf.mxu3 }
  0xb9   : > { %v442_v26 = vpop.f32.mrf.mxu0  ;;  %v452_v27 = vpop.f32.mrf.mxu1  ;;  %v879_v28 = vpack.c.bf16 %v459_v24, %v457_v18  ;;  %v889_v29 = vpack.c.bf16 %v469_v25, %v1048_v19  ;;  %v590_v0 = vmul.f32 %v459_v24, %v459_v24  ;;  %v594_v12 = vmul.f32 %v469_v25, %v469_v25 }
  0xba   : > { %v583_v32 = vmul.f32 %v442_v26, %v442_v26  ;;  %v561_v35 = vadd.f32 %v560_v33, %v442_v26  ;;  %v587_v51 = vmul.f32 %v452_v27, %v452_v27 }
  0xbb   : > { %899 = vst [vmem:[%s1055_s16 + $0x20] sm:$0xff] %v879_v28  }
  0xbc   : > { %901 = vst [vmem:[%s1055_s16 + $0x30] sm:$0xff] %v889_v29   ;;  %v598_v38 = vadd.f32 %v597_v34, %v583_v32 }
  0xc0   : > { %v462_v36 = vpop.f32.mrf.mxu2  ;;  %v472_v37 = vpop.f32.mrf.mxu3 }
  0xc1   : > { %v444_v39 = vpop.f32.mrf.mxu0  ;;  %v454_v40 = vpop.f32.mrf.mxu1  ;;  %v591_v4 = vmul.f32 %v462_v36, %v462_v36  ;;  %v595_v16 = vmul.f32 %v472_v37, %v472_v37 }
  0xc2   : > { %v864_v41 = vpack.c.bf16 %v444_v39, %v442_v26  ;;  %v562_v42 = vadd.f32 %v561_v35, %v444_v39  ;;  %v584_v43 = vmul.f32 %v444_v39, %v444_v39  ;;  %v874_v44 = vpack.c.bf16 %v454_v40, %v452_v27 }
  0xc3   : > { %v588_v59 = vmul.f32 %v454_v40, %v454_v40 }
  0xc4   : > { %896 = vst [vmem:[%s1055_s16 + $0x8] sm:$0xff] %v864_v41   ;;  %v563_v46 = vadd.f32 %v562_v42, %v447_v17  ;;  %v599_v47 = vadd.f32 %v598_v38, %v584_v43 }
  0xc5   : > { %898 = vst [vmem:[%s1055_s16 + $0x18] sm:$0xff] %v874_v44  }
  0xc6   : > { %v600_v49 = vadd.f32 %v599_v47, %v585_v45  ;;  %v564_v50 = vadd.f32 %v563_v46, %v449_v21 }
  0xc8   : > { %v565_v52 = vadd.f32 %v564_v50, %v452_v27  ;;  %v601_v53 = vadd.f32 %v600_v49, %v586_v48  ;;  %v464_v54 = vpop.f32.mrf.mxu2  ;;  %v474_v55 = vpop.f32.mrf.mxu3 }
  0xc9   : > { %v884_v56 = vpack.c.bf16 %v464_v54, %v462_v36  ;;  %v894_v57 = vpack.c.bf16 %v474_v55, %v472_v37  ;;  %v592_v8 = vmul.f32 %v464_v54, %v464_v54  ;;  %v596_v21 = vmul.f32 %v474_v55, %v474_v55 }
  0xca   : > { %v566_v58 = vadd.f32 %v565_v52, %v454_v40  ;;  %v602_v60 = vadd.f32 %v601_v53, %v587_v51 }
  0xcb   : > { %900 = vst [vmem:[%s1055_s16 + $0x28] sm:$0xff] %v884_v56  }
  0xcc   : > { %v567_v62 = vadd.f32 %v566_v58, %v457_v18  ;;  %v603_v63 = vadd.f32 %v602_v60, %v588_v59  ;;  %902 = vst [vmem:[%s1055_s16 + $0x38] sm:$0xff] %v894_v57  }
  0xce   : > { %v604_v1 = vadd.f32 %v603_v63, %v589_v61  ;;  %v568_v2 = vadd.f32 %v567_v62, %v459_v24 }
  0xd0   : > { %v569_v3 = vadd.f32 %v568_v2, %v462_v36  ;;  %v605_v5 = vadd.f32 %v604_v1, %v590_v0 }
  0xd2   : > { %v606_v6 = vadd.f32 %v605_v5, %v591_v4  ;;  %v570_v7 = vadd.f32 %v569_v3, %v464_v54 }
  0xd4   : > { %v571_v10 = vadd.f32 %v570_v7, %v1048_v19  ;;  %v607_v11 = vadd.f32 %v606_v6, %v592_v8 }
  0xd6   : > { %v608_v13 = vadd.f32 %v607_v11, %v593_v9  ;;  %v572_v14 = vadd.f32 %v571_v10, %v469_v25 }
  0xd8   : > { %v573_v15 = vadd.f32 %v572_v14, %v472_v37  ;;  %v609_v17 = vadd.f32 %v608_v13, %v594_v12 }
  0xda   : > { %v610_v18 = vadd.f32 %v609_v17, %v595_v16  ;;  %v574_v20 = vadd.f32 %v573_v15, %v474_v55 }
  0xdc   : > { %v575_v22 = vrot.slane %v574_v20, 4  ;;  %v611_v23 = vadd.f32 %v610_v18, %v596_v21 }
  0xde   : > { %v576_v24 = vadd.f32 %v575_v22, %v574_v20  ;;  %v612_v26 = vrot.slane %v611_v23, 4 }
  0xe0   : > { %v577_v27 = vrot.slane %v576_v24, 2  ;;  %v613_v28 = vadd.f32 %v612_v26, %v611_v23 }
  0xe2   : > { %v578_v19 = vadd.f32 %v577_v27, %v576_v24  ;;  %v614_v29 = vrot.slane %v613_v28, 2 }
  0xe4   : > { %v579_v30 = vrot.slane %v578_v19, 1  ;;  %v615_v31 = vadd.f32 %v614_v29, %v613_v28 }
  0xe6   : > { %v616_v25 = vrot.slane %v615_v31, 1  ;;  %v580_v32 = vadd.f32 %v579_v30, %v578_v19 }
  0xe8   : > { %v617_v33 = vadd.f32 %v616_v25, %v615_v31 }
  0xea   : > { %v619_v34 = vsel %vm618_vm0, %v580_v32, %v617_v33 }
  0xeb   : > { %v621_v35 = vsel %vm620_vm1, %v619_v34, 0.0 }
  0xec   : > { %622 = vst [vmem:[%s263_s20] sm:$0xff] %v621_v35 }
  0xed PF: > { %s14_s14 = sadd.s32 1, %s973_s14   ;;  %s1087_s12 = smov %s969_s13 }
  0xee   : > { %p11_p6 = scmp.ge.s32.totalorder %s14_s14, 6   ;;  %s1088_s13 = smov %s1090_s15 }
  0xf0   :  { %13 = sbr.rel (!%p11_p6) target bundleno = 2 (0x2), region = 81 }

// kernel: conv_block_forward.7
= control target key start
LH: loop header
LB: loop body
LE: loop exit
PB: predicated region body
PF: predicated region fallthrough
CT: control target
= control target key end

     0   :  { %s561_s12 = smov 0   ;;  %s563_s13 = smov 0   ;;  %s668_s0 = inlined_call_operand.vmem [shape: bf16[512,128], index: 0, kind: input, shape index: {}]   ;;  %s669_s1 = inlined_call_operand.vmem [shape: f32[1,128], index: 1, kind: input, shape index: {}]   ;;  %s670_s2 = inlined_call_operand.vmem [shape: f32[1,128], index: 2, kind: input, shape index: {}]   ;;  %s671_s3 = inlined_call_operand.vmem [shape: f32[512,128], index: 3, kind: output, shape index: {}]  }
   0x1   :  { %s565_s14 = smov 0  }
   0x2 LB: > { %s25_s15 = sadd.s32 1, %s535_s13  ;;  %p445_p0 = scmp.ge.s32.totalorder %s539_s14, 1  ;;  %s539_s14 = sphi %s565_s14, %s13_s14   ;;  %s535_s13 = sphi %s563_s13, %s673_s13   ;;  %s531_s12 = sphi %s561_s12, %s672_s12  }
   0x3   : > { %p27_p1 = scmp.ge.s32.totalorder %s25_s15, 4  ;;  %p173_p2 = scmp.lt.s32.totalorder %s539_s14, 5 }
   0x5   : > { %s675_s15 = smov (%p27_p1, %s25_s15), 0  ;;  %p174_p3 = pnand %p445_p0, %p173_p2 }
   0x6   : > { %s446_s16 = sshll.u32 (!%p174_p3), %s531_s12, 4 }
   0x7   : > { %177 = sbr.rel (%p174_p3) target bundleno = 40 (0x28), region = 32  ;;  %p210_p4 = scmp.lt.s32.totalorder (!%p174_p3), %s446_s16, 63 }
   0xc   : > { %s677_s16 = smov (!%p210_p4, %s446_s16), 63  ;;  %v590_v0 = vld [vmem:[%s669_s1] ss:$0 sm:$0xff] }
   0xd   : > { %s447_s17 = sshll.u32 %s677_s16, 2  ;;  %v598_v5 = vld [vmem:[%s670_s2] ss:$0 sm:$0xff]  ;;  %s449_s25 = sshll.u32 %s677_s16, 3 }
   0xe   : > { %s585_s20 = scalar_lea.vmem %s668_s0, %s447_s17  ;;  %s617_s28 = scalar_lea.vmem %s671_s3, %s449_s25 }
   0xf   : > { %v453_v1 = vld [vmem:[%s585_s20] sm:$0xff]   ;;  %v484_v2 = vld [vmem:[%s585_s20 + $0x8] sm:$0xff]   ;;  %v485_v3 = vld [vmem:[%s585_s20 + $0x10] sm:$0xff]  }
  0x10   : > { %v454_v4 = vunpack.c.l.bf16 %v453_v1  ;;  %v455_v6 = vunpack.c.h.bf16 %v453_v1  ;;  %v458_v7 = vunpack.c.l.bf16 %v484_v2  ;;  %v459_v8 = vunpack.c.h.bf16 %v484_v2  ;;  %v486_v9 = vld [vmem:[%s585_s20 + $0x18] sm:$0xff]   ;;  %v487_v30 = vld [vmem:[%s585_s20 + $0x20] sm:$0xff]   ;;  %v488_v31 = vld [vmem:[%s585_s20 + $0x28] sm:$0xff]  }
  0x11   : > { %v462_v10 = vunpack.c.l.bf16 %v485_v3  ;;  %v463_v11 = vunpack.c.h.bf16 %v485_v3  ;;  %v466_v12 = vunpack.c.l.bf16 %v486_v9  ;;  %v467_v13 = vunpack.c.h.bf16 %v486_v9  ;;  %v489_v36 = vld [vmem:[%s585_s20 + $0x30] sm:$0xff]   ;;  %v490_v37 = vld [vmem:[%s585_s20 + $0x38] sm:$0xff]  }
  0x12   : > { %v269_v14 = vmul.f32 %v590_v0, %v454_v4  ;;  %v270_v15 = vmul.f32 %v590_v0, %v455_v6  ;;  %v271_v16 = vmul.f32 %v590_v0, %v458_v7  ;;  %v272_v17 = vmul.f32 %v590_v0, %v459_v8 }
  0x13   : > { %v273_v18 = vmul.f32 %v590_v0, %v462_v10  ;;  %v274_v19 = vmul.f32 %v590_v0, %v463_v11  ;;  %v275_v20 = vmul.f32 %v590_v0, %v466_v12  ;;  %v276_v21 = vmul.f32 %v590_v0, %v467_v13 }
  0x14   : > { %v289_v22 = vadd.f32 %v598_v5, %v269_v14  ;;  %v290_v23 = vadd.f32 %v598_v5, %v270_v15  ;;  %v291_v24 = vadd.f32 %v598_v5, %v271_v16  ;;  %v292_v25 = vadd.f32 %v598_v5, %v272_v17 }
  0x15   : > { %v293_v26 = vadd.f32 %v598_v5, %v273_v18  ;;  %v294_v27 = vadd.f32 %v598_v5, %v274_v19  ;;  %v295_v28 = vadd.f32 %v598_v5, %v275_v20  ;;  %v296_v29 = vadd.f32 %v598_v5, %v276_v21 }
  0x16   : > { %v305_v32 = vmax.f32 %v289_v22, 0.0  ;;  %v306_v33 = vmax.f32 %v290_v23, 0.0  ;;  %v307_v34 = vmax.f32 %v291_v24, 0.0  ;;  %v308_v35 = vmax.f32 %v292_v25, 0.0 }
  0x17   : > { %v309_v38 = vmax.f32 %v293_v26, 0.0  ;;  %v310_v39 = vmax.f32 %v294_v27, 0.0  ;;  %v311_v40 = vmax.f32 %v295_v28, 0.0  ;;  %v312_v41 = vmax.f32 %v296_v29, 0.0 }
  0x18   : > { %321 = vst [vmem:[%s617_s28] sm:$0xff] %v305_v32  ;;  %v470_v42 = vunpack.c.l.bf16 %v487_v30  ;;  %v471_v43 = vunpack.c.h.bf16 %v487_v30  ;;  %v474_v44 = vunpack.c.l.bf16 %v488_v31  ;;  %v475_v45 = vunpack.c.h.bf16 %v488_v31 }
  0x19   : > { %322 = vst [vmem:[%s617_s28 + $0x8] sm:$0xff] %v306_v33  ;;  %v478_v46 = vunpack.c.l.bf16 %v489_v36  ;;  %v479_v47 = vunpack.c.h.bf16 %v489_v36  ;;  %v482_v48 = vunpack.c.l.bf16 %v490_v37  ;;  %v483_v49 = vunpack.c.h.bf16 %v490_v37 }
  0x1a   : > { %323 = vst [vmem:[%s617_s28 + $0x10] sm:$0xff] %v307_v34  ;;  %v277_v50 = vmul.f32 %v590_v0, %v470_v42  ;;  %v278_v51 = vmul.f32 %v590_v0, %v471_v43  ;;  %v279_v52 = vmul.f32 %v590_v0, %v474_v44  ;;  %v280_v53 = vmul.f32 %v590_v0, %v475_v45 }
  0x1b   : > { %324 = vst [vmem:[%s617_s28 + $0x18] sm:$0xff] %v308_v35  ;;  %v281_v54 = vmul.f32 %v590_v0, %v478_v46  ;;  %v282_v55 = vmul.f32 %v590_v0, %v479_v47  ;;  %v283_v56 = vmul.f32 %v590_v0, %v482_v48  ;;  %v284_v57 = vmul.f32 %v590_v0, %v483_v49 }
  0x1c   : > { %325 = vst [vmem:[%s617_s28 + $0x20] sm:$0xff] %v309_v38  ;;  %v297_v58 = vadd.f32 %v598_v5, %v277_v50  ;;  %v298_v59 = vadd.f32 %v598_v5, %v278_v51  ;;  %v299_v60 = vadd.f32 %v598_v5, %v279_v52  ;;  %v300_v61 = vadd.f32 %v598_v5, %v280_v53 }
  0x1d   : > { %326 = vst [vmem:[%s617_s28 + $0x28] sm:$0xff] %v310_v39  ;;  %v301_v62 = vadd.f32 %v598_v5, %v281_v54  ;;  %v302_v63 = vadd.f32 %v598_v5, %v282_v55  ;;  %v303_v3 = vadd.f32 %v598_v5, %v283_v56  ;;  %v304_v6 = vadd.f32 %v598_v5, %v284_v57 }
  0x1e   : > { %327 = vst [vmem:[%s617_s28 + $0x30] sm:$0xff] %v311_v40  ;;  %v313_v0 = vmax.f32 %v297_v58, 0.0  ;;  %v314_v1 = vmax.f32 %v298_v59, 0.0  ;;  %v315_v2 = vmax.f32 %v299_v60, 0.0  ;;  %v316_v4 = vmax.f32 %v300_v61, 0.0 }
  0x1f   : > { %328 = vst [vmem:[%s617_s28 + $0x38] sm:$0xff] %v312_v41  ;;  %v317_v7 = vmax.f32 %v301_v62, 0.0  ;;  %v318_v8 = vmax.f32 %v302_v63, 0.0  ;;  %v319_v9 = vmax.f32 %v303_v3, 0.0  ;;  %v320_v10 = vmax.f32 %v304_v6, 0.0 }
  0x20   : > { %329 = vst [vmem:[%s617_s28 + $0x40] sm:$0xff] %v313_v0 }
  0x21   : > { %330 = vst [vmem:[%s617_s28 + $0x48] sm:$0xff] %v314_v1 }
  0x22   : > { %331 = vst [vmem:[%s617_s28 + $0x50] sm:$0xff] %v315_v2 }
  0x23   : > { %332 = vst [vmem:[%s617_s28 + $0x58] sm:$0xff] %v316_v4 }
  0x24   : > { %333 = vst [vmem:[%s617_s28 + $0x60] sm:$0xff] %v317_v7 }
  0x25   : > { %334 = vst [vmem:[%s617_s28 + $0x68] sm:$0xff] %v318_v8 }
  0x26   : > { %335 = vst [vmem:[%s617_s28 + $0x70] sm:$0xff] %v319_v9 }
  0x27   : > { %336 = vst [vmem:[%s617_s28 + $0x78] sm:$0xff] %v320_v10 }
  0x28 PF: > { %s13_s14 = sadd.s32 1, %s539_s14   ;;  %s672_s12 = smov %s535_s13 }
  0x29   : > { %p10_p5 = scmp.ge.s32.totalorder %s13_s14, 6   ;;  %s673_s13 = smov %s675_s15 }
  0x2b   :  { %12 = sbr.rel (!%p10_p5) target bundleno = 2 (0x2), region = 68 }

</bundles_post_ra>
